<compile_context>
chip_gen: v6e
topology: v6e:2x2x1
jax: 0.10.0
libtpu: 0.0.40
codegen_flags: <defaults>
</compile_context>

<pallas_src>
import jax
import jax.numpy as jnp
from jax.experimental import pallas as pl
from jax.experimental.pallas import tpu as pltpu


# --------------------------- VMEM budget / tiling ---------------------------

_VMEM_LIMIT_CACHE = None


def _vmem_limit_bytes() -> int:
    """Scoped VMEM limit we explicitly request: half of physical, capped at 32 MiB.

    128 MiB physical on v5e/v6e and 64 MiB on v7x -> 32 MiB everywhere today,
    but self-sizes if a future part shrinks VMEM further.
    """
    global _VMEM_LIMIT_CACHE
    if _VMEM_LIMIT_CACHE is None:
        try:
            phys = int(pltpu.get_tpu_info().vmem_capacity_bytes)
        except Exception:
            phys = 64 << 20  # conservative: v7x physical per-TC VMEM
        _VMEM_LIMIT_CACHE = min(phys // 2, 32 << 20)
    return _VMEM_LIMIT_CACHE


def _density_tiles(D: int) -> tuple[int, int]:
    """Pick (TM, TN) so 2 f32 planes x 2 pipeline buffers <= ~50% of the scoped limit."""
    limit = _vmem_limit_bytes()
    if D >= 4096 and limit >= (32 << 20):
        tm, tn = 512, 2048   # 16 MiB double-buffered output; amortizes per-step overhead
    else:
        tm, tn = 256, 1024   # 4 MiB double-buffered; keeps >=2 i-tiles for mid-size D
    tm, tn = min(tm, D), min(tn, D)
    # Safety clamp: 2 planes x 2 buffers x tm*tn*4 B must stay <= limit/2.
    while 16 * tm * tn > limit // 2 and tm > 8:
        tm //= 2
    return tm, tn


# ----------------------------- Pallas kernels ------------------------------

def _density_kernel(scale_ref, rec_ref, imc_ref, rer_ref, imr_ref,
                    rho_re_ref, rho_im_ref):
    """One (TM, TN) tile of rho[i, j] = s * psi[i] * conj(psi[j]).

    s = 1 / max(||psi||, 1e-12)^2 (SMEM scalar) fuses torch.nn.functional.normalize
    into the outer product; it is applied once to the (TM, 1) ket column, so the
    per-element cost is one broadcast multiply. Broadcast VPU multiply on purpose:
    this kernel is HBM-write bound, a K=1 MXU matmul would only add latency.
    """
    s = scale_ref[0, 0]
    rc = rec_ref[...] * s          # (TM, 1) ket column, pre-scaled in-kernel
    ic = imc_ref[...] * s
    rr = rer_ref[...]              # (1, TN) bra row
    ir = imr_ref[...]
    # (a + ib) * (c - id) = (ac + bd) + i(bc - ad)
    rho_re_ref[...] = rc * rr + ic * ir
    rho_im_ref[...] = ic * rr - rc * ir


def _scale_kernel(scale_ref, re_ref, im_ref, ore_ref, oim_ref):
    """psi_out = s * psi for one block; s = 1/max(||psi||, 1e-12) held in SMEM."""
    s = scale_ref[0, 0]
    ore_ref[...] = re_ref[...] * s
    oim_ref[...] = im_ref[...] * s


# ------------------------------ JAX wrappers -------------------------------

def pallas_density(re_row: jax.Array, im_row: jax.Array, inv_scale):
    """rho = inv_scale * psi psi^H, returned as separate (D, D) f32 re/im planes."""
    D = re_row.shape[1]
    re_col = re_row.reshape(D, 1)
    im_col = im_row.reshape(D, 1)
    scale = jnp.asarray(inv_scale, jnp.float32).reshape(1, 1)
    out_shape = (jax.ShapeDtypeStruct((D, D), jnp.float32),
                 jax.ShapeDtypeStruct((D, D), jnp.float32))
    smem_spec = pl.BlockSpec(memory_space=pltpu.MemorySpace.SMEM)
    cost = pl.CostEstimate(flops=6 * D * D, transcendentals=0,
                           bytes_accessed=8 * D * D + 16 * D)

    tm, tn = _density_tiles(D)
    gm, gn = D // tm, D // tn

    if gm == 1 and gn == 1:
        # Small D: whole arrays in VMEM, no grid -> no per-step loop/DMA bookkeeping.
        vmem = pl.BlockSpec(memory_space=pltpu.MemorySpace.VMEM)
        return pl.pallas_call(
            _density_kernel,
            out_shape=out_shape,
            in_specs=[smem_spec, vmem, vmem, vmem, vmem],
            out_specs=(vmem, vmem),
            cost_estimate=cost,
        )(scale, re_col, im_col, re_row, im_row)

    # NOTE: grid order (i outer, j inner) + column index_map (i, 0) is intentional:
    # the ket-column block index is constant over the fast j axis, so Pallas skips
    # re-fetching (and re-scaling) the column every step. Do not reorder.
    col_spec = pl.BlockSpec((tm, 1), lambda i, j: (i, 0))
    row_spec = pl.BlockSpec((1, tn), lambda i, j: (0, j))
    out_spec = pl.BlockSpec((tm, tn), lambda i, j: (i, j))
    return pl.pallas_call(
        _density_kernel,
        out_shape=out_shape,
        grid=(gm, gn),
        in_specs=[smem_spec, col_spec, col_spec, row_spec, row_spec],
        out_specs=(out_spec, out_spec),
        cost_estimate=cost,
        compiler_params=pltpu.CompilerParams(
            dimension_semantics=("parallel", "parallel"),   # 2 TCs on v7x
            vmem_limit_bytes=_vmem_limit_bytes()),
    )(scale, re_col, im_col, re_row, im_row)


def pallas_scale(re_row: jax.Array, im_row: jax.Array, inv_norm):
    """psi / max(||psi||, eps) for a (1, D) re/im pair (inv_norm precomputed).

    Uses a sublane-dense (D//128, 128) layout so stores are full-vreg vst rather
    than 1/8-dense masked stores on a (1, TN) strip.
    """
    D = re_row.shape[1]
    scale = jnp.asarray(inv_norm, jnp.float32).reshape(1, 1)
    smem_spec = pl.BlockSpec(memory_space=pltpu.MemorySpace.SMEM)
    vmem = pl.BlockSpec(memory_space=pltpu.MemorySpace.VMEM)

    if D < 1024:
        # Tiny vector: whole (1, D) arrays in VMEM, no grid.
        out_shape = (jax.ShapeDtypeStruct((1, D), jnp.float32),
                     jax.ShapeDtypeStruct((1, D), jnp.float32))
        return pl.pallas_call(
            _scale_kernel,
            out_shape=out_shape,
            in_specs=[smem_spec, vmem, vmem],
            out_specs=(vmem, vmem),
        )(scale, re_row, im_row)

    rows = D // 128                       # power of 2, >= 8
    re2 = re_row.reshape(rows, 128)       # contiguous -> free metadata reshape
    im2 = im_row.reshape(rows, 128)
    out_shape = (jax.ShapeDtypeStruct((rows, 128), jnp.float32),
                 jax.ShapeDtypeStruct((rows, 128), jnp.float32))
    tr = min(rows, 2048)                  # 2048*128*4 B = 1 MiB per plane per step

    if tr == rows:
        ore, oim = pl.pallas_call(
            _scale_kernel,
            out_shape=out_shape,
            in_specs=[smem_spec, vmem, vmem],
            out_specs=(vmem, vmem),
        )(scale, re2, im2)
    else:
        blk = pl.BlockSpec((tr, 128), lambda c: (c, 0))
        ore, oim = pl.pallas_call(
            _scale_kernel,
            out_shape=out_shape,
            grid=(rows // tr,),
            in_specs=[smem_spec, blk, blk],
            out_specs=(blk, blk),
            compiler_params=pltpu.CompilerParams(
                dimension_semantics=("parallel",),
                vmem_limit_bytes=_vmem_limit_bytes()),
        )(scale, re2, im2)
    return ore.reshape(1, D), oim.reshape(1, D)


# ----------------------------- QubitState port ------------------------------

class QubitState:
    """JAX/Pallas port of deepquantum.QubitState.

    Canonical storage is f32 re/im planes (`state_re`, `state_im`) in the torch
    buffer layout ((2**n, 1) pure / (2**n, 2**n) density). The complex64 buffer
    matching the PyTorch module is built lazily via the `state` property (an
    extra D^2 read + 2*D^2 write of HBM for density matrices), so hot-path
    consumers should prefer the planar f32 planes.
    """

    def __init__(self, nqubit: int = 1, state='zeros', den_mat: bool = False):
        self.nqubit = nqubit
        self.den_mat = den_mat
        self._state_cplx = None
        D = 2 ** nqubit

        if isinstance(state, str) and state == 'zeros':
            re = jnp.zeros((1, D), jnp.float32).at[0, 0].set(1.0)
            im = jnp.zeros((1, D), jnp.float32)
            inv_norm = 1.0                                   # already unit norm
        elif isinstance(state, str) and state == 'equal':
            re = jnp.ones((1, D), jnp.float32)
            im = jnp.zeros((1, D), jnp.float32)
            inv_norm = 1.0 / (D ** 0.5)                      # analytic, no reduction
        elif isinstance(state, str) and state in ('entangle', 'GHZ', 'ghz'):
            v = 1.0 / (2.0 ** 0.5)
            re = jnp.zeros((1, D), jnp.float32).at[0, 0].set(v).at[0, D - 1].set(v)
            im = jnp.zeros((1, D), jnp.float32)
            inv_norm = 1.0
        else:
            # amplitude_encoding: flatten, truncate / zero-pad to 2**nqubit, then
            # L2-normalize (the normalization scale is fused into the kernels below).
            # TODO(synk): is_density_matrix() validation for custom density-matrix
            #             inputs is not re-implemented; custom inputs always take the
            #             amplitude-encoding (state-vector) path.
            data = jnp.asarray(state).reshape(-1).astype(jnp.complex64)
            data = data[:D]
            data = jnp.pad(data, (0, D - data.shape[0]))
            re = jnp.real(data).reshape(1, D).astype(jnp.float32)
            im = jnp.imag(data).reshape(1, D).astype(jnp.float32)
            # Tiny O(D) reduction in plain JAX; matches torch normalize eps clamp.
            nrm2 = jnp.sum(re * re + im * im)
            inv_norm = 1.0 / jnp.maximum(jnp.sqrt(nrm2), 1e-12)

        if den_mat:
            # Normalization fused into the outer product: scale = 1/||psi||^2.
            rho_re, rho_im = pallas_density(re, im, inv_norm * inv_norm)
            self.state_re, self.state_im = rho_re, rho_im
        else:
            if isinstance(inv_norm, float):
                if inv_norm != 1.0:                          # 'equal': analytic scale
                    re = re * inv_norm
                    im = im * inv_norm
            else:                                            # custom data: Pallas scale
                re, im = pallas_scale(re, im, inv_norm)
            self.state_re = re.reshape(D, 1)
            self.state_im = im.reshape(D, 1)

    @property
    def state(self) -> jax.Array:
        """complex64 buffer (torch.cfloat equivalent), built lazily and cached."""
        if self._state_cplx is None:
            self._state_cplx = jax.lax.complex(self.state_re, self.state_im)
        return self._state_cplx

    def forward(self) -> None:
        """Pass. (Matches the PyTorch module: forward is a no-op.)"""
        pass

    def __call__(self):
        return self.forward()


# ---------------------------------- main ------------------------------------

if __name__ == "__main__":
    key = jax.random.PRNGKey(0)

    # --- D = 128 (nqubit = 7): lane-aligned, exercises the no-grid fast paths ---
    nqubit = 7
    D = 2 ** nqubit

    # 1) GHZ density matrix (fused-scale outer-product kernel, scale = 1).
    ghz = QubitState(nqubit=nqubit, state='ghz', den_mat=True)
    rho = jax.block_until_ready(ghz.state)
    assert rho.shape == (D, D) and rho.dtype == jnp.complex64
    psi_ref = jnp.zeros((D,), jnp.complex64).at[0].set(1 / 2**0.5).at[-1].set(1 / 2**0.5)
    assert jnp.allclose(rho, jnp.outer(psi_ref, jnp.conj(psi_ref)), atol=1e-6)

    # 2) 'equal' pure state (analytic normalization, no kernel needed).
    eq = QubitState(nqubit=nqubit, state='equal', den_mat=False)
    psi_eq = jax.block_until_ready(eq.state)
    assert psi_eq.shape == (D, 1) and psi_eq.dtype == jnp.complex64
    assert jnp.allclose(psi_eq, jnp.full((D, 1), 1.0 / D**0.5, jnp.complex64), atol=1e-6)

    # 3) 'equal' density matrix (normalization fused into the density kernel).
    eq_dm = QubitState(nqubit=nqubit, state='equal', den_mat=True)
    rho_eq = jax.block_until_ready(eq_dm.state)
    assert jnp.allclose(rho_eq, jnp.full((D, D), 1.0 / D, jnp.complex64), atol=1e-6)

    # 4) Custom complex data -> amplitude encoding (small-D scale kernel).
    kr, ki = jax.random.split(key)
    data = (jax.random.normal(kr, (D,), jnp.float32)
            + 1j * jax.random.normal(ki, (D,), jnp.float32)).astype(jnp.complex64)
    custom = QubitState(nqubit=nqubit, state=data, den_mat=False)
    psi_c = jax.block_until_ready(custom.state)
    psi_c_ref = (data / jnp.maximum(jnp.linalg.norm(data), 1e-12)).reshape(D, 1)
    assert jnp.allclose(psi_c, psi_c_ref, atol=1e-6)

    # --- D = 512 (nqubit = 9): exercises the tiled / gridded density path ------
    nq2 = 9
    D2 = 2 ** nq2
    kr2, ki2 = jax.random.split(ki)
    data2 = (jax.random.normal(kr2, (D2,), jnp.float32)
             + 1j * jax.random.normal(ki2, (D2,), jnp.float32)).astype(jnp.complex64)
    custom_dm = QubitState(nqubit=nq2, state=data2, den_mat=True)
    rho_c = jax.block_until_ready(custom_dm.state)
    assert rho_c.shape == (D2, D2) and rho_c.dtype == jnp.complex64
    psi2 = data2 / jnp.maximum(jnp.linalg.norm(data2), 1e-12)
    assert jnp.allclose(rho_c, jnp.outer(psi2, jnp.conj(psi2)), atol=1e-5)

    # --- D = 2048 (nqubit = 11): exercises the sublane-dense 2D scale layout ---
    nq3 = 11
    D3 = 2 ** nq3
    kr3, ki3 = jax.random.split(ki2)
    data3 = (jax.random.normal(kr3, (D3,), jnp.float32)
             + 1j * jax.random.normal(ki3, (D3,), jnp.float32)).astype(jnp.complex64)
    custom3 = QubitState(nqubit=nq3, state=data3, den_mat=False)
    psi3 = jax.block_until_ready(custom3.state)
    psi3_ref = (data3 / jnp.maximum(jnp.linalg.norm(data3), 1e-12)).reshape(D3, 1)
    assert jnp.allclose(psi3, psi3_ref, atol=1e-6)

    # forward() is a no-op, as in the PyTorch module.
    assert ghz() is None

    print("KERNEL_OK")
</pallas_src>

<mosaic_0001>
module attributes {stable_mosaic.version = 11 : i64} {
  func.func @_density_kernel(%arg0: memref<1x1xf32, #tpu.memory_space<smem>>, %arg1: memref<128x1xf32, #tpu.memory_space<vmem>>, %arg2: memref<128x1xf32, #tpu.memory_space<vmem>>, %arg3: memref<1x128xf32, #tpu.memory_space<vmem>>, %arg4: memref<1x128xf32, #tpu.memory_space<vmem>>, %arg5: memref<128x128xf32, #tpu.memory_space<vmem>>, %arg6: memref<128x128xf32, #tpu.memory_space<vmem>>) attributes {dimension_semantics = [], scalar_prefetch = 0 : i64, scratch_operands = 0 : i64, tpu.core_type = #tpu.core_type<tc>} {
    %c0 = arith.constant 0 : index
    %c0_0 = arith.constant 0 : index
    %0 = memref.load %arg0[%c0, %c0_0] : memref<1x1xf32, #tpu.memory_space<smem>>
    %c0_1 = arith.constant 0 : index
    %c0_2 = arith.constant 0 : index
    %1 = vector.load %arg1[%c0_1, %c0_2] : memref<128x1xf32, #tpu.memory_space<vmem>>, vector<128x1xf32>
    %2 = vector.broadcast %0 : f32 to vector<128x1xf32>
    %3 = arith.mulf %1, %2 : vector<128x1xf32>
    %c0_3 = arith.constant 0 : index
    %c0_4 = arith.constant 0 : index
    %4 = vector.load %arg2[%c0_3, %c0_4] : memref<128x1xf32, #tpu.memory_space<vmem>>, vector<128x1xf32>
    %5 = vector.broadcast %0 : f32 to vector<128x1xf32>
    %6 = arith.mulf %4, %5 : vector<128x1xf32>
    %c0_5 = arith.constant 0 : index
    %c0_6 = arith.constant 0 : index
    %7 = vector.load %arg3[%c0_5, %c0_6] : memref<1x128xf32, #tpu.memory_space<vmem>>, vector<1x128xf32>
    %c0_7 = arith.constant 0 : index
    %c0_8 = arith.constant 0 : index
    %8 = vector.load %arg4[%c0_7, %c0_8] : memref<1x128xf32, #tpu.memory_space<vmem>>, vector<1x128xf32>
    %9 = vector.broadcast %3 : vector<128x1xf32> to vector<128x128xf32>
    %10 = vector.broadcast %7 : vector<1x128xf32> to vector<128x128xf32>
    %11 = arith.mulf %9, %10 : vector<128x128xf32>
    %12 = vector.broadcast %6 : vector<128x1xf32> to vector<128x128xf32>
    %13 = vector.broadcast %8 : vector<1x128xf32> to vector<128x128xf32>
    %14 = arith.mulf %12, %13 : vector<128x128xf32>
    %15 = arith.addf %11, %14 : vector<128x128xf32>
    %c0_9 = arith.constant 0 : index
    %c0_10 = arith.constant 0 : index
    %16 = vector.load %arg5[%c0_9, %c0_10] : memref<128x128xf32, #tpu.memory_space<vmem>>, vector<128x128xf32>
    tpu.vector_store %arg5[%c0_9, %c0_10], %15 {strides = array<i32>} : memref<128x128xf32, #tpu.memory_space<vmem>>, vector<128x128xf32>,
    %17 = vector.broadcast %6 : vector<128x1xf32> to vector<128x128xf32>
    %18 = vector.broadcast %7 : vector<1x128xf32> to vector<128x128xf32>
    %19 = arith.mulf %17, %18 : vector<128x128xf32>
    %20 = vector.broadcast %3 : vector<128x1xf32> to vector<128x128xf32>
    %21 = vector.broadcast %8 : vector<1x128xf32> to vector<128x128xf32>
    %22 = arith.mulf %20, %21 : vector<128x128xf32>
    %23 = arith.subf %19, %22 : vector<128x128xf32>
    %c0_11 = arith.constant 0 : index
    %c0_12 = arith.constant 0 : index
    %24 = vector.load %arg6[%c0_11, %c0_12] : memref<128x128xf32, #tpu.memory_space<vmem>>, vector<128x128xf32>
    tpu.vector_store %arg6[%c0_11, %c0_12], %23 {strides = array<i32>} : memref<128x128xf32, #tpu.memory_space<vmem>>, vector<128x128xf32>,
    return
  }
}

</mosaic_0001>

<bundles_post_ra>
// kernel: tpu_custom_call.1
= control target key start
LH: loop header
LB: loop body
LE: loop exit
PB: predicated region body
PF: predicated region fallthrough
CT: control target
= control target key end

     0   :  { %13 = vsyncpa [#allocation4], 0  ;;  %v478_v4 = vmov 0   ;;  %s771_s0 = inlined_call_operand.<no memory space> [shape: f32[1,1], index: 0, kind: input, shape index: {}]   ;;  %s772_s1 = inlined_call_operand.vmem [shape: f32[128,1], index: 1, kind: input, shape index: {}]   ;;  %s773_s2 = inlined_call_operand.vmem [shape: f32[128,1], index: 2, kind: input, shape index: {}]   ;;  %s774_s3 = inlined_call_operand.vmem [shape: f32[1,128], index: 3, kind: input, shape index: {}]   ;;  %s775_s4 = inlined_call_operand.vmem [shape: f32[1,128], index: 4, kind: input, shape index: {}]   ;;  %s776_s5 = inlined_call_operand.hbm [shape: f32[128,128], index: 5, kind: output, shape index: {0}]   ;;  %s777_s6 = inlined_call_operand.hbm [shape: f32[128,128], index: 6, kind: output, shape index: {1}]  }
   0x1   :  { %v28_v0 = vld [vmem:[%s772_s1 + $0x10] sm:$0xff]  ;;  %v524_v1 = vstv %s771_s0  ;;  %v26_v2 = vld [vmem:[%s772_s1] sm:$0xff]  ;;  %v29_v3 = vld [vmem:[%s772_s1 + $0x18] sm:$0xff]  ;;  %433 = vset.pattern.permute.xlu1 %v478_v4  ;;  %432 = vset.pattern.permute.xlu0 %v478_v4 }
   0x2   :  { %v45_v5 = vmul.f32 %v524_v1, %v28_v0  ;;  %v43_v6 = vmul.f32 %v524_v1, %v26_v2  ;;  %v27_v7 = vld [vmem:[%s772_s1 + $0x8] sm:$0xff]  ;;  %v46_v8 = vmul.f32 %v524_v1, %v29_v3  ;;  %v30_v11 = vld [vmem:[%s772_s1 + $0x20] sm:$0xff]  ;;  %v33_v14 = vld [vmem:[%s772_s1 + $0x38] sm:$0xff] }
   0x3   :  { %v44_v9 = vmul.f32 %v524_v1, %v27_v7  ;;  %v31_v10 = vld [vmem:[%s772_s1 + $0x28] sm:$0xff]  ;;  %v47_v13 = vmul.f32 %v524_v1, %v30_v11  ;;  %v32_v15 = vld [vmem:[%s772_s1 + $0x30] sm:$0xff]  ;;  %v50_v16 = vmul.f32 %v524_v1, %v33_v14 }
   0x4   :  { %105 = vperm.xlu1 %433, %v45_v5   ;;  %95 = vperm.xlu0 %432, %v43_v6   ;;  %v48_v12 = vmul.f32 %v524_v1, %v31_v10  ;;  %v49_v17 = vmul.f32 %v524_v1, %v32_v15 }
   0x8   :  { %110 = vperm.xlu1 %433, %v46_v8   ;;  %100 = vperm.xlu0 %432, %v44_v9  }
   0xc   :  { %120 = vperm.xlu1 %433, %v48_v12   ;;  %115 = vperm.xlu0 %432, %v47_v13  }
   0xd   :  { %14 = vsyncpa [#allocation6], 0  ;;  %v35_v18 = vld [vmem:[%s772_s1 + $0x48] sm:$0xff]  ;;  %v34_v19 = vld [vmem:[%s772_s1 + $0x40] sm:$0xff]  ;;  %s480_s13 = smov [#allocation5]  }
   0xe   :  { %v52_v20 = vmul.f32 %v524_v1, %v35_v18  ;;  %v51_v21 = vmul.f32 %v524_v1, %v34_v19  ;;  %v37_v22 = vld [vmem:[%s772_s1 + $0x58] sm:$0xff]  ;;  %v36_v23 = vld [vmem:[%s772_s1 + $0x50] sm:$0xff]  ;;  %v39_v26 = vld [vmem:[%s772_s1 + $0x68] sm:$0xff]  ;;  %s410_s14 = sshll.u32 %s480_s13, 4  ;;  %s411_s14 = int_to_ptr.vmem [resolvable:$true] %s410_s14 }
   0xf   :  { %v54_v24 = vmul.f32 %v524_v1, %v37_v22  ;;  %v53_v25 = vmul.f32 %v524_v1, %v36_v23  ;;  %v38_v27 = vld [vmem:[%s772_s1 + $0x60] sm:$0xff]  ;;  %v56_v28 = vmul.f32 %v524_v1, %v39_v26  ;;  %v41_v30 = vld [vmem:[%s772_s1 + $0x78] sm:$0xff]  ;;  %v40_v31 = vld [vmem:[%s772_s1 + $0x70] sm:$0xff] }
  0x10   :  { %130 = vperm.xlu1 %433, %v50_v16   ;;  %125 = vperm.xlu0 %432, %v49_v17   ;;  %v55_v29 = vmul.f32 %v524_v1, %v38_v27  ;;  %v58_v32 = vmul.f32 %v524_v1, %v41_v30  ;;  %v57_v33 = vmul.f32 %v524_v1, %v40_v31  ;;  %v60_v34 = vld [vmem:[%s773_s2 + $0x8] sm:$0xff]  ;;  %v59_v35 = vld [vmem:[%s773_s2] sm:$0xff]  ;;  %v62_v38 = vld [vmem:[%s773_s2 + $0x18] sm:$0xff] }
  0x11   :  { %v76_v36 = vmul.f32 %v60_v34, %v524_v1  ;;  %v75_v37 = vmul.f32 %v59_v35, %v524_v1  ;;  %v61_v39 = vld [vmem:[%s773_s2 + $0x10] sm:$0xff]  ;;  %v78_v40 = vmul.f32 %v62_v38, %v524_v1  ;;  %v64_v42 = vld [vmem:[%s773_s2 + $0x28] sm:$0xff]  ;;  %v63_v43 = vld [vmem:[%s773_s2 + $0x20] sm:$0xff] }
  0x12   :  { %v77_v41 = vmul.f32 %v61_v39, %v524_v1  ;;  %v80_v44 = vmul.f32 %v64_v42, %v524_v1  ;;  %v79_v45 = vmul.f32 %v63_v43, %v524_v1  ;;  %v66_v46 = vld [vmem:[%s773_s2 + $0x38] sm:$0xff]  ;;  %v65_v47 = vld [vmem:[%s773_s2 + $0x30] sm:$0xff]  ;;  %v68_v50 = vld [vmem:[%s773_s2 + $0x48] sm:$0xff] }
  0x13   :  { %v82_v48 = vmul.f32 %v66_v46, %v524_v1  ;;  %v81_v49 = vmul.f32 %v65_v47, %v524_v1  ;;  %v67_v51 = vld [vmem:[%s773_s2 + $0x40] sm:$0xff]  ;;  %v84_v52 = vmul.f32 %v68_v50, %v524_v1  ;;  %v70_v54 = vld [vmem:[%s773_s2 + $0x58] sm:$0xff]  ;;  %v69_v55 = vld [vmem:[%s773_s2 + $0x50] sm:$0xff] }
  0x14   :  { %140 = vperm.xlu1 %433, %v52_v20   ;;  %135 = vperm.xlu0 %432, %v51_v21   ;;  %v83_v53 = vmul.f32 %v67_v51, %v524_v1  ;;  %v86_v56 = vmul.f32 %v70_v54, %v524_v1  ;;  %v85_v57 = vmul.f32 %v69_v55, %v524_v1  ;;  %v72_v58 = vld [vmem:[%s773_s2 + $0x68] sm:$0xff]  ;;  %v71_v59 = vld [vmem:[%s773_s2 + $0x60] sm:$0xff]  ;;  %v74_v62 = vld [vmem:[%s773_s2 + $0x78] sm:$0xff] }
  0x15   :  { %v88_v60 = vmul.f32 %v72_v58, %v524_v1  ;;  %v87_v61 = vmul.f32 %v71_v59, %v524_v1  ;;  %v73_v63 = vld [vmem:[%s773_s2 + $0x70] sm:$0xff]  ;;  %v90_v0 = vmul.f32 %v74_v62, %v524_v1  ;;  %v674_v18 = vld [vmem:[%s774_s3] ss:$0 sm:$0xff]  ;;  %s479_s3 = smov [#allocation3]  }
  0x16   :  { %v89_v2 = vmul.f32 %v73_v63, %v524_v1  ;;  %v679_v19 = vld [vmem:[%s775_s4] ss:$0 sm:$0xff]  ;;  %s398_s4 = sshll.u32 %s479_s3, 4  ;;  %s399_s4 = int_to_ptr.vmem [resolvable:$true] %s398_s4 }
  0x17   :  { %s434_s15 = scalar_lea.vmem %s399_s4, 2048  ;;  %p439_p1 = scmp.lt.s32.totalorder %s399_s4, %s399_s4 }
  0x18   :  { %150 = vperm.xlu1 %433, %v54_v24   ;;  %145 = vperm.xlu0 %432, %v53_v25   ;;  %p435_p0 = scmp.ne.s32.totalorder %s399_s4, %s434_s15  ;;  %p440_p2 = scmp.lt.s32.totalorder %s434_s15, %s434_s15 }
  0x1a   :  { %p441_p3 = por %p440_p2, %p439_p1 }
  0x1c   :  { %160 = vperm.xlu1 %433, %v56_v28   ;;  %155 = vperm.xlu0 %432, %v55_v29   ;;  %p442_p4 = pnand %p441_p3, %p435_p0 }
  0x20   :  { %170 = vperm.xlu1 %433, %v58_v32   ;;  %165 = vperm.xlu0 %432, %v57_v33  }
  0x24   :  { %202 = vperm.xlu1 %433, %v76_v36   ;;  %197 = vperm.xlu0 %432, %v75_v37  }
  0x28   :  { %212 = vperm.xlu1 %433, %v78_v40   ;;  %207 = vperm.xlu0 %432, %v77_v41  }
  0x2c   :  { %222 = vperm.xlu1 %433, %v80_v44   ;;  %217 = vperm.xlu0 %432, %v79_v45  }
  0x30   :  { %232 = vperm.xlu1 %433, %v82_v48   ;;  %227 = vperm.xlu0 %432, %v81_v49  }
  0x34   :  { %242 = vperm.xlu1 %433, %v84_v52   ;;  %237 = vperm.xlu0 %432, %v83_v53  }
  0x38   :  { %252 = vperm.xlu1 %433, %v86_v56   ;;  %247 = vperm.xlu0 %432, %v85_v57  }
  0x3c   :  { %262 = vperm.xlu1 %433, %v88_v60   ;;  %257 = vperm.xlu0 %432, %v87_v61  }
  0x40   :  { %272 = vperm.xlu1 %433, %v90_v0   ;;  %267 = vperm.xlu0 %432, %v89_v2  }
  0x7f   :  { %v106_v3 = vpop.permute.xlu1 %105  ;;  %v96_v4 = vpop.permute.xlu0 %95 }
  0x80   :  { %v179_v20 = vmul.f32 %v674_v18, %v96_v4  ;;  %v345_v21 = vmul.f32 %v679_v19, %v96_v4  ;;  %v181_v34 = vmul.f32 %v674_v18, %v106_v3  ;;  %v347_v35 = vmul.f32 %v679_v19, %v106_v3 }
  0x83   :  { %v111_v5 = vpop.permute.xlu1 %110  ;;  %v101_v6 = vpop.permute.xlu0 %100 }
  0x84   :  { %v180_v22 = vmul.f32 %v674_v18, %v101_v6  ;;  %v346_v23 = vmul.f32 %v679_v19, %v101_v6  ;;  %v182_v36 = vmul.f32 %v674_v18, %v111_v5  ;;  %v348_v37 = vmul.f32 %v679_v19, %v111_v5 }
  0x87   :  { %v121_v7 = vpop.permute.xlu1 %120  ;;  %v116_v8 = vpop.permute.xlu0 %115 }
  0x88   :  { %v184_v48 = vmul.f32 %v674_v18, %v121_v7  ;;  %v350_v49 = vmul.f32 %v679_v19, %v121_v7  ;;  %v183_v50 = vmul.f32 %v674_v18, %v116_v8  ;;  %v349_v51 = vmul.f32 %v679_v19, %v116_v8 }
  0x8b   :  { %v651_v9 = vpop.permute.xlu1 %130  ;;  %v653_v10 = vpop.permute.xlu0 %125 }
  0x8c   :  { %v186_v62 = vmul.f32 %v674_v18, %v651_v9  ;;  %v352_v63 = vmul.f32 %v679_v19, %v651_v9  ;;  %v185_v0 = vmul.f32 %v674_v18, %v653_v10  ;;  %v351_v2 = vmul.f32 %v679_v19, %v653_v10 }
  0x8f   :  { %v655_v11 = vpop.permute.xlu1 %140  ;;  %v657_v12 = vpop.permute.xlu0 %135 }
  0x90   :  { %v188_v10 = vmul.f32 %v674_v18, %v655_v11 }
  0x93   :  { %v659_v13 = vpop.permute.xlu1 %150  ;;  %v661_v14 = vpop.permute.xlu0 %145 }
  0x97   :  { %v663_v1 = vpop.permute.xlu1 %160  ;;  %v665_v15 = vpop.permute.xlu0 %155 }
  0x9b   :  { %v667_v16 = vpop.permute.xlu1 %170  ;;  %v669_v17 = vpop.permute.xlu0 %165 }
  0x9f   :  { %v203_v24 = vpop.permute.xlu1 %202  ;;  %v198_v25 = vpop.permute.xlu0 %197 }
  0xa0   :  { %v282_v26 = vmul.f32 %v679_v19, %v203_v24  ;;  %v330_v27 = vmul.f32 %v674_v18, %v203_v24  ;;  %v281_v28 = vmul.f32 %v679_v19, %v198_v25  ;;  %v329_v29 = vmul.f32 %v674_v18, %v198_v25 }
  0xa1   :  { %v187_v24 = vmul.f32 %v674_v18, %v657_v12  ;;  %v353_v25 = vmul.f32 %v679_v19, %v657_v12  ;;  %v190_v12 = vmul.f32 %v674_v18, %v659_v13 }
  0xa2   :  { %v298_v30 = vadd.f32 %v282_v26, %v180_v22  ;;  %v362_v31 = vsub.f32 %v330_v27, %v346_v23  ;;  %v297_v32 = vadd.f32 %v281_v28, %v179_v20  ;;  %v361_v33 = vsub.f32 %v329_v29, %v345_v21 }
  0xa3   :  { %v213_v38 = vpop.permute.xlu1 %212  ;;  %v208_v39 = vpop.permute.xlu0 %207  ;;  %v354_v23 = vmul.f32 %v679_v19, %v655_v11 }
  0xa4   :  { %314 = vst [vmem:[#allocation3 + $0x8] sm:$0xff] %v298_v30  ;;  %378 = vst [vmem:[#allocation5 + $0x8] sm:$0xff] %v362_v31  ;;  %v284_v40 = vmul.f32 %v679_v19, %v213_v38  ;;  %v332_v41 = vmul.f32 %v674_v18, %v213_v38  ;;  %v283_v42 = vmul.f32 %v679_v19, %v208_v39 }
  0xa5   :  { %313 = vst [vmem:[#allocation3] sm:$0xff] %v297_v32  ;;  %377 = vst [vmem:[#allocation5] sm:$0xff] %v361_v33  ;;  %v331_v43 = vmul.f32 %v674_v18, %v208_v39 }
  0xa6   :  { %v300_v44 = vadd.f32 %v284_v40, %v182_v36  ;;  %v364_v45 = vsub.f32 %v332_v41, %v348_v37  ;;  %v299_v46 = vadd.f32 %v283_v42, %v181_v34  ;;  %v189_v36 = vmul.f32 %v674_v18, %v661_v14 }
  0xa7   :  { %v363_v47 = vsub.f32 %v331_v43, %v347_v35  ;;  %v223_v52 = vpop.permute.xlu1 %222  ;;  %v218_v53 = vpop.permute.xlu0 %217  ;;  %v356_v35 = vmul.f32 %v679_v19, %v659_v13  ;;  %v355_v37 = vmul.f32 %v679_v19, %v661_v14  ;;  %v192_v14 = vmul.f32 %v674_v18, %v663_v1 }
  0xa8   :  { %316 = vst [vmem:[#allocation3 + $0x18] sm:$0xff] %v300_v44  ;;  %380 = vst [vmem:[#allocation5 + $0x18] sm:$0xff] %v364_v45  ;;  %v286_v54 = vmul.f32 %v679_v19, %v223_v52  ;;  %v334_v55 = vmul.f32 %v674_v18, %v223_v52  ;;  %v285_v56 = vmul.f32 %v679_v19, %v218_v53 }
  0xa9   :  { %315 = vst [vmem:[#allocation3 + $0x10] sm:$0xff] %v299_v46  ;;  %379 = vst [vmem:[#allocation5 + $0x10] sm:$0xff] %v363_v47  ;;  %v333_v57 = vmul.f32 %v674_v18, %v218_v53  ;;  %v358_v47 = vmul.f32 %v679_v19, %v663_v1 }
  0xaa   :  { %v302_v58 = vadd.f32 %v286_v54, %v184_v48  ;;  %v366_v59 = vsub.f32 %v334_v55, %v350_v49  ;;  %v301_v60 = vadd.f32 %v285_v56, %v183_v50  ;;  %v191_v48 = vmul.f32 %v674_v18, %v665_v15 }
  0xab   :  { %v365_v61 = vsub.f32 %v333_v57, %v349_v51  ;;  %v233_v3 = vpop.permute.xlu1 %232  ;;  %v228_v4 = vpop.permute.xlu0 %227  ;;  %v357_v49 = vmul.f32 %v679_v19, %v665_v15  ;;  %v194_v15 = vmul.f32 %v674_v18, %v667_v16 }
  0xac   :  { %318 = vst [vmem:[#allocation3 + $0x28] sm:$0xff] %v302_v58  ;;  %382 = vst [vmem:[#allocation5 + $0x28] sm:$0xff] %v366_v59  ;;  %v288_v5 = vmul.f32 %v679_v19, %v233_v3  ;;  %v336_v6 = vmul.f32 %v674_v18, %v233_v3  ;;  %v287_v7 = vmul.f32 %v679_v19, %v228_v4 }
  0xad   :  { %317 = vst [vmem:[#allocation3 + $0x20] sm:$0xff] %v301_v60  ;;  %381 = vst [vmem:[#allocation5 + $0x20] sm:$0xff] %v365_v61  ;;  %v335_v8 = vmul.f32 %v674_v18, %v228_v4  ;;  %v360_v59 = vmul.f32 %v679_v19, %v667_v16  ;;  %v193_v60 = vmul.f32 %v674_v18, %v669_v17 }
  0xae   :  { %v304_v9 = vadd.f32 %v288_v5, %v186_v62  ;;  %v368_v20 = vsub.f32 %v336_v6, %v352_v63  ;;  %v303_v21 = vadd.f32 %v287_v7, %v185_v0  ;;  %v359_v61 = vmul.f32 %v679_v19, %v669_v17 }
  0xaf   :  { %v367_v22 = vsub.f32 %v335_v8, %v351_v2  ;;  %v243_v26 = vpop.permute.xlu1 %242  ;;  %v238_v27 = vpop.permute.xlu0 %237 }
  0xb0   :  { %320 = vst [vmem:[#allocation3 + $0x38] sm:$0xff] %v304_v9  ;;  %384 = vst [vmem:[#allocation5 + $0x38] sm:$0xff] %v368_v20  ;;  %v290_v28 = vmul.f32 %v679_v19, %v243_v26  ;;  %v338_v29 = vmul.f32 %v674_v18, %v243_v26  ;;  %v289_v30 = vmul.f32 %v679_v19, %v238_v27 }
  0xb1   :  { %319 = vst [vmem:[#allocation3 + $0x30] sm:$0xff] %v303_v21  ;;  %383 = vst [vmem:[#allocation5 + $0x30] sm:$0xff] %v367_v22  ;;  %v337_v11 = vmul.f32 %v674_v18, %v238_v27 }
  0xb2   :  { %v306_v31 = vadd.f32 %v290_v28, %v188_v10  ;;  %v370_v32 = vsub.f32 %v338_v29, %v354_v23  ;;  %v305_v33 = vadd.f32 %v289_v30, %v187_v24 }
  0xb3   :  { %v369_v34 = vsub.f32 %v337_v11, %v353_v25  ;;  %v253_v38 = vpop.permute.xlu1 %252  ;;  %v248_v39 = vpop.permute.xlu0 %247 }
  0xb4   :  { %322 = vst [vmem:[#allocation3 + $0x48] sm:$0xff] %v306_v31  ;;  %386 = vst [vmem:[#allocation5 + $0x48] sm:$0xff] %v370_v32  ;;  %v292_v40 = vmul.f32 %v679_v19, %v253_v38  ;;  %v340_v41 = vmul.f32 %v674_v18, %v253_v38  ;;  %v291_v42 = vmul.f32 %v679_v19, %v248_v39 }
  0xb5   :  { %321 = vst [vmem:[#allocation3 + $0x40] sm:$0xff] %v305_v33  ;;  %385 = vst [vmem:[#allocation5 + $0x40] sm:$0xff] %v369_v34  ;;  %v339_v13 = vmul.f32 %v674_v18, %v248_v39 }
  0xb6   :  { %v308_v43 = vadd.f32 %v292_v40, %v190_v12  ;;  %v372_v44 = vsub.f32 %v340_v41, %v356_v35  ;;  %v307_v45 = vadd.f32 %v291_v42, %v189_v36 }
  0xb7   :  { %v371_v46 = vsub.f32 %v339_v13, %v355_v37  ;;  %v263_v50 = vpop.permute.xlu1 %262  ;;  %v258_v51 = vpop.permute.xlu0 %257 }
  0xb8   :  { %324 = vst [vmem:[#allocation3 + $0x58] sm:$0xff] %v308_v43  ;;  %388 = vst [vmem:[#allocation5 + $0x58] sm:$0xff] %v372_v44  ;;  %v294_v52 = vmul.f32 %v679_v19, %v263_v50  ;;  %v342_v53 = vmul.f32 %v674_v18, %v263_v50  ;;  %v293_v54 = vmul.f32 %v679_v19, %v258_v51 }
  0xb9   :  { %323 = vst [vmem:[#allocation3 + $0x50] sm:$0xff] %v307_v45  ;;  %387 = vst [vmem:[#allocation5 + $0x50] sm:$0xff] %v371_v46  ;;  %v341_v1 = vmul.f32 %v674_v18, %v258_v51 }
  0xba   :  { %v310_v55 = vadd.f32 %v294_v52, %v192_v14  ;;  %v374_v56 = vsub.f32 %v342_v53, %v358_v47  ;;  %v309_v57 = vadd.f32 %v293_v54, %v191_v48 }
  0xbb   :  { %v373_v58 = vsub.f32 %v341_v1, %v357_v49  ;;  %v273_v62 = vpop.permute.xlu1 %272  ;;  %v268_v63 = vpop.permute.xlu0 %267 }
  0xbc   :  { %326 = vst [vmem:[#allocation3 + $0x68] sm:$0xff] %v310_v55  ;;  %390 = vst [vmem:[#allocation5 + $0x68] sm:$0xff] %v374_v56  ;;  %v296_v0 = vmul.f32 %v679_v19, %v273_v62  ;;  %v344_v2 = vmul.f32 %v674_v18, %v273_v62  ;;  %v295_v3 = vmul.f32 %v679_v19, %v268_v63 }
  0xbd   :  { %325 = vst [vmem:[#allocation3 + $0x60] sm:$0xff] %v309_v57  ;;  %389 = vst [vmem:[#allocation5 + $0x60] sm:$0xff] %v373_v58  ;;  %v343_v16 = vmul.f32 %v674_v18, %v268_v63 }
  0xbe   :  { %v312_v4 = vadd.f32 %v296_v0, %v194_v15  ;;  %v376_v5 = vsub.f32 %v344_v2, %v360_v59  ;;  %v311_v17 = vadd.f32 %v295_v3, %v193_v60 }
  0xbf   :  { %v375_v6 = vsub.f32 %v343_v16, %v359_v61 }
  0xc0   :  { %328 = vst [vmem:[#allocation3 + $0x78] sm:$0xff] %v312_v4  ;;  %392 = vst [vmem:[#allocation5 + $0x78] sm:$0xff] %v376_v5 }
  0xc1   :  { %327 = vst [vmem:[#allocation3 + $0x70] sm:$0xff] %v311_v17  ;;  %391 = vst [vmem:[#allocation5 + $0x70] sm:$0xff] %v375_v6 }
  0xc2   :  { %445 = shalt.err (!%p442_p4)
}
  0xc3   :  { %s481_s16 = smov 128   ;;  %s482_s17 = smov 8  }
  0xc4   :  { %404 = dma.vmem_to_hbm [thread:$0]  %s399_s4, 2048, %s776_s5, [#allocation4], %s481_s16, %s481_s16, %s482_s17  }
  0xc5   :  { %s454_s20 = scalar_lea.vmem %s411_s14, 2048  ;;  %p459_p6 = scmp.lt.s32.totalorder %s411_s14, %s411_s14 }
  0xc6   :  { %p455_p5 = scmp.ne.s32.totalorder %s411_s14, %s454_s20  ;;  %p460_p7 = scmp.lt.s32.totalorder %s454_s20, %s454_s20 }
  0xc8   :  { %p461_p8 = por %p460_p7, %p459_p6 }
  0xca   :  { %p462_p9 = pnand %p461_p8, %p455_p5 }
  0xcc   :  { %465 = shalt.err (!%p462_p9)
}
  0xcd   :  { %416 = dma.vmem_to_hbm [thread:$0]  %s411_s14, 2048, %s777_s6, [#allocation6], %s481_s16, %s481_s16, %s482_s17  }
  0xce   :  { %474 = dma.done.wait [#allocation4], 2048  }
  0xcf   :  { %475 = vsyncadd [#allocation4], 4294965248 }
  0xd0   :  { %476 = dma.done.wait [#allocation6], 2048  }
  0xd1   :  { %477 = vsyncadd [#allocation6], 4294965248 }
  0xd2   :  { %423 = vsyncpa [#allocation4], 1 }
  0xd3   :  { %424 = vsyncpa [#allocation6], 1 }

</bundles_post_ra>
